<compile_context>
chip_gen: v5e
topology: v5e:2x2
jax: 0.10.0
libtpu: 0.0.40
codegen_flags: <defaults>
</compile_context>

<pallas_src>
import jax
import jax.numpy as jnp
from jax.experimental import pallas as pl
from jax.experimental.pallas import tpu as pltpu


# ----------------------------------------------------------------------------
# Kernels
# ----------------------------------------------------------------------------
def _sym_batched_kernel(x_ref, o_ref):
    # x_ref / o_ref: (BT, n, n).  BT is a small static constant; per-matrix
    # 2-D transposes keep the lowering on the plain minor-2D XLU path.
    for i in range(x_ref.shape[0]):
        xi = x_ref[i]
        o_ref[i] = xi + xi.T


def _sym_tri_kernel(i_tab_ref, j_tab_ref, a_ref, b_ref, o_ref):
    # a_ref = x[b, i, j] tile, b_ref = x[b, j, i] tile.  Their index_maps are
    # constant across the innermost "side" axis, so each is fetched once per
    # (i, j) pair and reused for both output blocks.
    side = pl.program_id(2)

    @pl.when(side == 0)
    def _():
        o_ref[...] = a_ref[...] + b_ref[...].T        # -> out[b, i, j]

    @pl.when(side == 1)
    def _():
        o_ref[...] = b_ref[...] + a_ref[...].T        # -> out[b, j, i]


# ----------------------------------------------------------------------------
# Tiling heuristics
# ----------------------------------------------------------------------------
def _pick_tile(n: int) -> int:
    """Tile for the large-matrix path: prefer exact divisors (no masking),
    otherwise a fixed 256 tile with masked edge blocks.  t <= 512 keeps the
    double-buffered pipeline inside every generation's scoped-VMEM default."""
    for t in (512, 256):
        if n % t == 0:
            return t
    return 256


def _pick_batch_tile(b: int, n: int, itemsize: int) -> int:
    """How many (n, n) matrices to process per grid step on the small path."""
    budget = 8 * 1024 * 1024                 # in + out, double-buffered
    per_mat = 4 * n * n * itemsize
    bt = max(1, budget // per_mat)
    bt = min(bt, 32, b)                      # bound the static in-kernel loop
    if b >= 2:
        bt = min(bt, (b + 1) // 2)           # >= 2 grid steps -> v7x megacore
    return int(max(1, bt))


# ----------------------------------------------------------------------------
# Wrapper
# ----------------------------------------------------------------------------
def symmetrize(x):
    """Return x + x.transpose(-1, -2) (last two dims must be square)."""
    *lead, n, m = x.shape
    assert n == m, "Symmetrization requires a square trailing matrix"
    b = 1
    for d in lead:
        b *= d
    x3 = x.reshape(b, n, n)

    itemsize = jnp.dtype(x.dtype).itemsize
    nbytes = b * n * n * itemsize
    cost = pl.CostEstimate(flops=b * n * n, transcendentals=0,
                           bytes_accessed=2 * nbytes)

    if n <= 512:
        # --- small-matrix path: single input, batched over leading dim -----
        bt = _pick_batch_tile(b, n, itemsize)
        out = pl.pallas_call(
            _sym_batched_kernel,
            out_shape=jax.ShapeDtypeStruct((b, n, n), x.dtype),
            grid=(pl.cdiv(b, bt),),
            in_specs=[pl.BlockSpec((bt, n, n), lambda i: (i, 0, 0))],
            out_specs=pl.BlockSpec((bt, n, n), lambda i: (i, 0, 0)),
            compiler_params=pltpu.CompilerParams(
                dimension_semantics=("parallel",),
                vmem_limit_bytes=32 * 1024 * 1024),
            cost_estimate=cost,
        )(x3)
    else:
        # --- large-matrix path: upper-triangular tile pairs -----------------
        t = _pick_tile(n)
        nb = pl.cdiv(n, t)
        pairs = [(i, j) for i in range(nb) for j in range(i, nb)]
        i_tab = jnp.asarray([p[0] for p in pairs], jnp.int32)
        j_tab = jnp.asarray([p[1] for p in pairs], jnp.int32)
        npairs = len(pairs)

        def a_map(bb, k, s, i_t, j_t):          # x[b, i, j] tile
            return (bb, i_t[k], j_t[k])

        def b_map(bb, k, s, i_t, j_t):          # x[b, j, i] tile (mirror)
            return (bb, j_t[k], i_t[k])

        def o_map(bb, k, s, i_t, j_t):          # side 0 -> (i, j), side 1 -> (j, i)
            i = i_t[k]
            j = j_t[k]
            ns = 1 - s
            return (bb, i * ns + j * s, j * ns + i * s)

        out = pl.pallas_call(
            _sym_tri_kernel,
            out_shape=jax.ShapeDtypeStruct((b, n, n), x.dtype),
            grid_spec=pltpu.PrefetchScalarGridSpec(
                num_scalar_prefetch=2,
                grid=(b, npairs, 2),
                in_specs=[
                    pl.BlockSpec((pl.Squeezed(), t, t), a_map),
                    pl.BlockSpec((pl.Squeezed(), t, t), b_map),
                ],
                out_specs=pl.BlockSpec((pl.Squeezed(), t, t), o_map),
            ),
            compiler_params=pltpu.CompilerParams(
                dimension_semantics=("parallel", "parallel", "arbitrary"),
                vmem_limit_bytes=32 * 1024 * 1024),
            cost_estimate=cost,
        )(i_tab, j_tab, x3, x3)

    return out.reshape(x.shape)


# ----------------------------------------------------------------------------
# Pure-JAX reference.
# ----------------------------------------------------------------------------
def ref_symmetrize(x):
    return x + jnp.swapaxes(x, -1, -2)


if __name__ == "__main__":
    key = jax.random.PRNGKey(0)
    k1, k2, k3 = jax.random.split(key, 3)

    # Spec-consistent small shape (batch=2, channels=4, 16x16 pairwise maps):
    # exercises the batched single-input path.
    x_small = jax.random.normal(k1, (2, 4, 16, 16), jnp.float32)
    out_small = symmetrize(x_small)
    jax.block_until_ready(out_small)
    assert out_small.shape == x_small.shape
    assert jnp.allclose(out_small, ref_symmetrize(x_small), atol=1e-6, rtol=1e-6)
    assert jnp.allclose(out_small, jnp.swapaxes(out_small, -1, -2),
                        atol=1e-6, rtol=1e-6)

    # Triangular tiled path, N a multiple of the 256 tile.
    x_big = jax.random.normal(k2, (2, 768, 768), jnp.float32)
    out_big = symmetrize(x_big)
    jax.block_until_ready(out_big)
    assert jnp.allclose(out_big, ref_symmetrize(x_big), atol=1e-6, rtol=1e-6)

    # Triangular tiled path with masked (partial) edge blocks.
    x_odd = jax.random.normal(k3, (1, 600, 600), jnp.float32)
    out_odd = symmetrize(x_odd)
    jax.block_until_ready(out_odd)
    assert jnp.allclose(out_odd, ref_symmetrize(x_odd), atol=1e-6, rtol=1e-6)

    print("KERNEL_OK")
</pallas_src>

<mosaic_0001>
module attributes {stable_mosaic.version = 11 : i64} {
  func.func @_sym_batched_kernel(%arg0: i32, %arg1: memref<4x16x16xf32, #tpu.memory_space<vmem>>, %arg2: memref<4x16x16xf32, #tpu.memory_space<vmem>>) attributes {dimension_semantics = [#tpu.dimension_semantics<parallel>], iteration_bounds = array<i64: 2>, scalar_prefetch = 0 : i64, scratch_operands = 0 : i64, tpu.core_type = #tpu.core_type<tc>, window_params = [{transform_indices = @transform_0, window_bounds = array<i64: 4, 16, 16>}, {transform_indices = @transform_1, window_bounds = array<i64: 4, 16, 16>}]} {
    %c0 = arith.constant 0 : index
    %c0_0 = arith.constant 0 : index
    %c0_1 = arith.constant 0 : index
    %0 = vector.load %arg1[%c0, %c0_0, %c0_1] : memref<4x16x16xf32, #tpu.memory_space<vmem>>, vector<1x16x16xf32>
    %1 = vector.shape_cast %0 : vector<1x16x16xf32> to vector<16x16xf32>
    %2 = tpu.transpose %1, [1, 0] : vector<16x16xf32> -> vector<16x16xf32>
    %3 = arith.addf %1, %2 : vector<16x16xf32>
    %c0_2 = arith.constant 0 : index
    %c0_3 = arith.constant 0 : index
    %c0_4 = arith.constant 0 : index
    %4 = vector.load %arg2[%c0_2, %c0_3, %c0_4] : memref<4x16x16xf32, #tpu.memory_space<vmem>>, vector<1x16x16xf32>
    %5 = vector.shape_cast %4 : vector<1x16x16xf32> to vector<16x16xf32>
    %6 = vector.shape_cast %3 : vector<16x16xf32> to vector<1x16x16xf32>
    tpu.vector_store %arg2[%c0_2, %c0_3, %c0_4], %6 {strides = array<i32>} : memref<4x16x16xf32, #tpu.memory_space<vmem>>, vector<1x16x16xf32>,
    %c1 = arith.constant 1 : index
    %c0_5 = arith.constant 0 : index
    %c0_6 = arith.constant 0 : index
    %7 = vector.load %arg1[%c1, %c0_5, %c0_6] : memref<4x16x16xf32, #tpu.memory_space<vmem>>, vector<1x16x16xf32>
    %8 = vector.shape_cast %7 : vector<1x16x16xf32> to vector<16x16xf32>
    %9 = tpu.transpose %8, [1, 0] : vector<16x16xf32> -> vector<16x16xf32>
    %10 = arith.addf %8, %9 : vector<16x16xf32>
    %c1_7 = arith.constant 1 : index
    %c0_8 = arith.constant 0 : index
    %c0_9 = arith.constant 0 : index
    %11 = vector.load %arg2[%c1_7, %c0_8, %c0_9] : memref<4x16x16xf32, #tpu.memory_space<vmem>>, vector<1x16x16xf32>
    %12 = vector.shape_cast %11 : vector<1x16x16xf32> to vector<16x16xf32>
    %13 = vector.shape_cast %10 : vector<16x16xf32> to vector<1x16x16xf32>
    tpu.vector_store %arg2[%c1_7, %c0_8, %c0_9], %13 {strides = array<i32>} : memref<4x16x16xf32, #tpu.memory_space<vmem>>, vector<1x16x16xf32>,
    %c2 = arith.constant 2 : index
    %c0_10 = arith.constant 0 : index
    %c0_11 = arith.constant 0 : index
    %14 = vector.load %arg1[%c2, %c0_10, %c0_11] : memref<4x16x16xf32, #tpu.memory_space<vmem>>, vector<1x16x16xf32>
    %15 = vector.shape_cast %14 : vector<1x16x16xf32> to vector<16x16xf32>
    %16 = tpu.transpose %15, [1, 0] : vector<16x16xf32> -> vector<16x16xf32>
    %17 = arith.addf %15, %16 : vector<16x16xf32>
    %c2_12 = arith.constant 2 : index
    %c0_13 = arith.constant 0 : index
    %c0_14 = arith.constant 0 : index
    %18 = vector.load %arg2[%c2_12, %c0_13, %c0_14] : memref<4x16x16xf32, #tpu.memory_space<vmem>>, vector<1x16x16xf32>
    %19 = vector.shape_cast %18 : vector<1x16x16xf32> to vector<16x16xf32>
    %20 = vector.shape_cast %17 : vector<16x16xf32> to vector<1x16x16xf32>
    tpu.vector_store %arg2[%c2_12, %c0_13, %c0_14], %20 {strides = array<i32>} : memref<4x16x16xf32, #tpu.memory_space<vmem>>, vector<1x16x16xf32>,
    %c3 = arith.constant 3 : index
    %c0_15 = arith.constant 0 : index
    %c0_16 = arith.constant 0 : index
    %21 = vector.load %arg1[%c3, %c0_15, %c0_16] : memref<4x16x16xf32, #tpu.memory_space<vmem>>, vector<1x16x16xf32>
    %22 = vector.shape_cast %21 : vector<1x16x16xf32> to vector<16x16xf32>
    %23 = tpu.transpose %22, [1, 0] : vector<16x16xf32> -> vector<16x16xf32>
    %24 = arith.addf %22, %23 : vector<16x16xf32>
    %c3_17 = arith.constant 3 : index
    %c0_18 = arith.constant 0 : index
    %c0_19 = arith.constant 0 : index
    %25 = vector.load %arg2[%c3_17, %c0_18, %c0_19] : memref<4x16x16xf32, #tpu.memory_space<vmem>>, vector<1x16x16xf32>
    %26 = vector.shape_cast %25 : vector<1x16x16xf32> to vector<16x16xf32>
    %27 = vector.shape_cast %24 : vector<16x16xf32> to vector<1x16x16xf32>
    tpu.vector_store %arg2[%c3_17, %c0_18, %c0_19], %27 {strides = array<i32>} : memref<4x16x16xf32, #tpu.memory_space<vmem>>, vector<1x16x16xf32>,
    return
  }
  func.func @transform_0(%arg0: i32) -> (i32, i32, i32) {
    %c0_i32 = arith.constant 0 : i32
    %c0_i32_0 = arith.constant 0 : i32
    %c0_i32_1 = arith.constant 0 : i32
    return %arg0, %c0_i32, %c0_i32_0 : i32, i32, i32
  }
  func.func @transform_1(%arg0: i32) -> (i32, i32, i32) {
    %c0_i32 = arith.constant 0 : i32
    %c0_i32_0 = arith.constant 0 : i32
    %c0_i32_1 = arith.constant 0 : i32
    return %arg0, %c0_i32, %c0_i32_0 : i32, i32, i32
  }
}

</mosaic_0001>

<bundles_post_ra>
// kernel: tpu_custom_call.1
= control target key start
LH: loop header
LB: loop body
LE: loop exit
PB: predicated region body
PF: predicated region fallthrough
CT: control target
= control target key end

     0   :  { %6 = vsyncpa [#allocation3], 0  ;;  %s719_s0 = inlined_call_operand.hbm [shape: f32[8,16,16], index: 0, kind: input, shape index: {}]   ;;  %s720_s1 = inlined_call_operand.hbm [shape: f32[8,16,16], index: 1, kind: output, shape index: {}]  }
   0x1   :  { %8 = vsyncpa [#allocation3 + $0x1], 0 }
   0x2   :  { %9 = vsyncpa [#allocation4], 0 }
   0x3   :  { %11 = vsyncpa [#allocation4 + $0x1], 0  ;;  %s584_s6 = smov 0   ;;  %s586_s7 = smov 0  }
   0x4   :  { %s588_s8 = smov 0   ;;  %s590_s9 = smov 0  }
   0x5 LB: > { %s605_s10 = sadd.s32 4294967295, %s568_s9   ;;  %s389_s11 = sadd.s32 4294967294, %s568_s9   ;;  %s568_s9 = sphi %s590_s9, %s730_s9   ;;  %s564_s8 = sphi %s588_s8, %s729_s8   ;;  %s560_s7 = sphi %s586_s7, %s728_s7   ;;  %s556_s6 = sphi %s584_s6, %s727_s6  }
   0x6   : > { %s609_s12 = sadd.s32 1, %s568_s9   ;;  %s24_s13 = sadd.s32 1, %s564_s8 }
   0x7   : > { %s21_s14 = ssub.s32 %s568_s9, %s609_s12  ;;  %p31_p0 = scmp.ne.s32.totalorder %s564_s8, %s560_s7 }
   0x8   : > { %p22_p1 = scmp.eq.s32.totalorder %s21_s14, 0  ;;  %p32_p2 = scmp.eq.s32.totalorder %s568_s9, 0 }
   0x9   : > { %p37_p3 = scmp.ne.s32.totalorder %s560_s7, %s556_s6  ;;  %p38_p4 = scmp.eq.s32.totalorder %s605_s10, 0 }
   0xa   : > { %s621_s15 = scalar_select %p22_p1, %s564_s8, %s24_s13  }
   0xb   : > { %p623_p5 = por %p32_p2, %p31_p0  ;;  %p627_p6 = por %p38_p4, %p37_p3 }
   0xc   : > { %p61_p7 = scmp.eq.s32.totalorder %s605_s10, 1  ;;  %p67_p8 = scmp.eq.s32.totalorder %s389_s11, 1 }
   0xd   : > { %p433_p10 = scmp.lt.s32.totalorder %s568_s9, 2  ;;  %s87_s20 = sand.u32 1, %s564_s8  }
   0xe   : > { %p634_p11 = por %p61_p7, %p31_p0  ;;  %p638_p12 = por %p67_p8, %p37_p3 }
   0xf   : > { %s418_s21 = sshll.u32 %s568_s9, 6  ;;  %s392_s22 = sshll.u32 %s87_s20, 6 }
  0x10   : > { %s97_s25 = scalar_lea.hbm %s719_s0, %s418_s21  ;;  %s91_s27 = scalar_lea.vmem [#allocation2], %s392_s22 }
  0x11   : > { %s98_s26 = sshll.u32 %s97_s25, 4  ;;  %s100_s28 = sshll.u32 %s91_s27, 4  ;;  %s99_s26 = int_to_ptr.hbm [resolvable:$true] %s98_s26  ;;  %s101_s28 = int_to_ptr.vmem [resolvable:$true] %s100_s28 }
  0x12   : > { %p649_p13 = pnand %p433_p10, %p623_p5  ;;  %p396_p0 = scmp.ge.s32.totalorder %s568_s9, 1 }
  0x13   : > { %p108_p1 = scmp.lt.s32.totalorder %s568_s9, 3  ;;  %s88_s30 = scalar_lea.sflag [#allocation3], %s87_s20 }
  0x14   : > { %s472_s2 = sshra.s32 %s99_s26, 4  ;;  %p476_p3 = pneg %p649_p13  ;;  %s473_s2 = int_to_ptr.hbm [resolvable:$true] %s472_s2 }
  0x15   : > { %s474_s3 = scalar_lea.hbm %s473_s2, 64  ;;  %s479_s11 = scalar_lea.hbm %s719_s0, 128 }
  0x16   : > { %p475_p2 = scmp.ne.s32.totalorder %s473_s2, %s474_s3  ;;  %p480_p5 = scmp.lt.s32.totalorder %s473_s2, %s719_s0 }
  0x17   : > { %p481_p8 = scmp.lt.s32.totalorder %s479_s11, %s474_s3 }
  0x18   : > { %p477_p4 = pnand %p476_p3, %p475_p2 }
  0x19   : > { %p482_p10 = por %p481_p8, %p480_p5 }
  0x1a   : > { %p478_p7 = pneg %p477_p4 }
  0x1c   : > { %p483_p9 = pnand %p482_p10, %p478_p7 }
  0x1e   : > { %486 = shalt.err (!%p483_p9)
}
  0x1f   : > { %s570_s16 = smov 128   ;;  %s571_s20 = smov 8  }
  0x20   : > { %428 = dma.hbm_to_vmem [thread:$0]  (!%p649_p13), %s99_s26, 1024, %s101_s28, %s88_s30, %s570_s16, %s570_s16, %s571_s20  }
  0x21   : > { %p109_p2 = pnand %p396_p0, %p108_p1 }
  0x22   : > { %s670_s21 = sand.u32 (!%p109_p2), 1, %s560_s7  }
  0x23   : > { %112 = sbr.rel (%p109_p2) target bundleno = 237 (0xed), region = 24  ;;  %s397_s22 = sshll.u32 (!%p109_p2), %s670_s21, 6 }
  0x24   : > { %s115_s23 = scalar_lea.sflag (!%p109_p2), [#allocation3], %s670_s21  ;;  %s118_s24 = scalar_lea.vmem (!%p109_p2), [#allocation2], %s397_s22 }
  0x28   : > { %547 = dma.done.wait (%p627_p6), %s115_s23, 1024  }
  0x29   : > { %549 = vsyncadd (%p627_p6), %s115_s23, 4294966272  ;;  %v140_v0 = vld [vmem:[%s118_s24] sm:$0xff]  ;;  %v399_v1 = vld [vmem:[%s118_s24 + $0x10] sm:$0xff]  ;;  %vm176_vm0 = vcmask 130048   ;;  %s137_s17 = scalar_lea.vmem [#allocation5], %s397_s22  ;;  %s420_s25 = sshll.u32 %s605_s10, 6 }
  0x2a   : > { %142 = vxpose.xlu0.b32.start [1/2] (short) (narrow) %v140_v0, 16  ;;  %182 = vxpose.xlu1.b32.start [1/2] (short) (narrow) %v399_v1, 16  ;;  %v403_v2 = vld [vmem:[%s118_s24 + $0x20] sm:$0xff]  ;;  %v141_v3 = vld [vmem:[%s118_s24 + $0x8] sm:$0xff]  ;;  %v400_v4 = vld [vmem:[%s118_s24 + $0x18] sm:$0xff]  ;;  %s312_s28 = scalar_lea.hbm %s720_s1, %s420_s25  ;;  %s313_s29 = sshll.u32 %s137_s17, 4  ;;  %s314_s29 = int_to_ptr.vmem [resolvable:$true] %s313_s29 }
  0x2b   : > { %222 = vxpose.xlu2.b32.start [1/2] (short) (narrow) %v403_v2, 16  ;;  %v404_v5 = vld [vmem:[%s118_s24 + $0x28] sm:$0xff]  ;;  %v407_v6 = vld [vmem:[%s118_s24 + $0x30] sm:$0xff]  ;;  %v408_v7 = vld [vmem:[%s118_s24 + $0x38] sm:$0xff]  ;;  %s315_s30 = sshll.u32 %s312_s28, 4  ;;  %s300_s2 = scalar_lea.sflag [#allocation4], %s670_s21  ;;  %s316_s30 = int_to_ptr.hbm [resolvable:$true] %s315_s30 }
  0x2c   : > { %s516_s3 = sshra.s32 %s316_s30, 4  ;;  %s522_s11 = scalar_lea.hbm %s720_s1, 128  ;;  %s517_s3 = int_to_ptr.hbm [resolvable:$true] %s516_s3 }
  0x2d   : > { %s518_s10 = scalar_lea.hbm %s517_s3, 64  ;;  %p523_p0 = scmp.lt.s32.totalorder %s517_s3, %s720_s1 }
  0x2e   : > { %p519_p6 = scmp.ne.s32.totalorder %s517_s3, %s518_s10  ;;  %p524_p1 = scmp.lt.s32.totalorder %s522_s11, %s518_s10 }
  0x30   : > { %p520_p9 = pnand %p519_p6, %p634_p11  ;;  %p525_p3 = por %p524_p1, %p523_p0 }
  0x32   : > { %143 = vxpose.xlu0.b32.end [2/2] (short) (narrow) %v141_v3, 16  ;;  %183 = vxpose.xlu1.b32.end [2/2] (short) (narrow) %v400_v4, 16  ;;  %p521_p13 = pneg %p520_p9 }
  0x33   : > { %223 = vxpose.xlu2.b32.end [2/2] (short) (narrow) %v404_v5, 16 }
  0x34   : > { %p526_p4 = pnand %p525_p3, %p521_p13 }
  0x3a   : > { %262 = vxpose.xlu0.b32.start [1/2] (short) (narrow) %v407_v6, 16 }
  0x42   : > { %263 = vxpose.xlu0.b32.end [2/2] (short) (narrow) %v408_v7, 16 }
  0xc4   : > { %v238_v8 = vpop.trf.xlu2 }
  0xc5   : > { %v254_v9 = vadd.f32 %v403_v2, %v238_v8 }
  0xc7   : > { %405 = vst.msk [vmem:[%s137_s17 + $0x20] sm:$0xff] %vm176_vm0, %v254_v9 }
  0xcc   : > { %v239_v10 = vpop.trf.xlu2 }
  0xcd   : > { %v255_v13 = vadd.f32 %v404_v5, %v239_v10 }
  0xce   : > { %v158_v11 = vpop.trf.xlu0  ;;  %v198_v12 = vpop.trf.xlu1 }
  0xcf   : > { %v174_v14 = vadd.f32 %v158_v11, %v140_v0  ;;  %v214_v15 = vadd.f32 %v399_v1, %v198_v12  ;;  %406 = vst.msk [vmem:[%s137_s17 + $0x28] sm:$0xff] %vm176_vm0, %v255_v13 }
  0xd1   : > { %177 = vst.msk [vmem:[%s137_s17] sm:$0xff] %vm176_vm0, %v174_v14 }
  0xd2   : > { %401 = vst.msk [vmem:[%s137_s17 + $0x10] sm:$0xff] %vm176_vm0, %v214_v15 }
  0xd6   : > { %v159_v16 = vpop.trf.xlu0  ;;  %v199_v17 = vpop.trf.xlu1 }
  0xd7   : > { %v175_v18 = vadd.f32 %v159_v16, %v141_v3  ;;  %v215_v19 = vadd.f32 %v400_v4, %v199_v17 }
  0xd9   : > { %178 = vst.msk [vmem:[%s137_s17 + $0x8] sm:$0xff] %vm176_vm0, %v175_v18 }
  0xda   : > { %402 = vst.msk [vmem:[%s137_s17 + $0x18] sm:$0xff] %vm176_vm0, %v215_v19 }
  0xde   : > { %v278_v20 = vpop.trf.xlu0 }
  0xdf   : > { %v294_v21 = vadd.f32 %v407_v6, %v278_v20 }
  0xe1   : > { %409 = vst.msk [vmem:[%s137_s17 + $0x30] sm:$0xff] %vm176_vm0, %v294_v21 }
  0xe6   : > { %v279_v22 = vpop.trf.xlu0 }
  0xe7   : > { %v295_v23 = vadd.f32 %v408_v7, %v279_v22 }
  0xe9   : > { %410 = vst.msk [vmem:[%s137_s17 + $0x38] sm:$0xff] %vm176_vm0, %v295_v23 }
  0xea   : > { %529 = shalt.err (!%p526_p4)
}
  0xeb   : > { %s572_s16 = smov 128   ;;  %s573_s20 = smov 8  }
  0xec   : > { %423 = dma.vmem_to_hbm [thread:$0]  (%p634_p11), %s314_s29, 1024, %s316_s30, %s300_s2, %s572_s16, %s572_s16, %s573_s20  }
  0xed PF: > { %s330_s21 = sand.u32 1, %s556_s6   ;;  %p726_p7 = scmp.ge.s32.totalorder %s568_s9, 2 }
  0xee   : > { %s331_s22 = scalar_lea.sflag [#allocation4], %s330_s21 }
  0xef   : > { %p430_p5 = pnand %p726_p7, %p638_p12 }
  0xf1   : > { %p431_p8 = pneg %p430_p5 }
  0xf3   : > { %551 = dma.done.wait (%p431_p8), %s331_s22, 1024  }
  0xf4   : > { %553 = vsyncadd (%p431_p8), %s331_s22, 4294966272  ;;  %p14_p10 = scmp.ge.s32.totalorder %s609_s12, 4   ;;  %s727_s6 = smov %s560_s7 }
  0xf5   : > { %s728_s7 = smov %s564_s8  ;;  %s729_s8 = smov %s621_s15 }
  0xf6   : > { %s730_s9 = smov %s609_s12  ;;  %16 = sbr.rel (!%p14_p10) target bundleno = 5 (0x5), region = 75 }
  0xfb   :  { %337 = vsyncpa [#allocation3], 1 }
  0xfc   :  { %339 = vsyncpa [#allocation3 + $0x1], 1 }
  0xfd   :  { %340 = vsyncpa [#allocation4], 1 }
  0xfe   :  { %342 = vsyncpa [#allocation4 + $0x1], 1 }

</bundles_post_ra>
